<compile_context>
chip_gen: v7x
topology: tpu7x:2x2x1
jax: 0.10.0
libtpu: 0.0.40
codegen_flags: <defaults>
</compile_context>

<pallas_src>
import functools

import jax
import jax.numpy as jnp
from jax.experimental import pallas as pl
from jax.experimental.pallas import tpu as pltpu

LANE = 128


def _round_up(x, m):
    return (x + m - 1) // m * m


def _pad_params(w1, b1, w2, b2, compute_dtype):
    """Zero-pad weights/biases to lane-dense (128-multiple) widths.

    KB-scale work; under jit it is trivial, and a training loop calling the
    forward un-jitted can hoist this out and reuse the padded params.
    """
    n_states, n_neurons = w1.shape
    n_actions = w2.shape[1]
    S = _round_up(n_states, LANE)
    H = _round_up(n_neurons, LANE)
    A = _round_up(n_actions, LANE)

    w1p = jnp.zeros((S, H), dtype=compute_dtype)
    w1p = w1p.at[:n_states, :n_neurons].set(w1.astype(compute_dtype))
    b1p = jnp.zeros((1, H), dtype=jnp.float32)
    b1p = b1p.at[0, :n_neurons].set(b1.astype(jnp.float32))
    w2p = jnp.zeros((H, A), dtype=compute_dtype)
    w2p = w2p.at[:n_neurons, :n_actions].set(w2.astype(compute_dtype))
    # b2 stays unpadded: it is added after slicing down to n_actions columns.
    b2p = b2.astype(jnp.float32).reshape(1, n_actions)
    return w1p, b1p, w2p, b2p


def asv_actor_forward(x, w1, b1, w2, b2, bound, *,
                      block_batch=4096, compute_dtype=jnp.bfloat16):
    """Forward pass of ASVActorNet: tanh(relu(x@w1 + b1)@w2 + b2) * bound.

    x:  [B, n_states]            w1: [n_states, n_neurons]   b1: [n_neurons]
    w2: [n_neurons, n_actions]   b2: [n_actions]
    bound: static Python scalar (action multiplier).
    Returns [B, n_actions] float32.
    """
    B, n_states = x.shape
    n_neurons = w1.shape[1]
    n_actions = w2.shape[1]

    S = _round_up(n_states, LANE)
    H = _round_up(n_neurons, LANE)
    A = _round_up(n_actions, LANE)

    # Batch tile: native sublane tile is 16 rows for bf16 (32 for 8-bit,
    # 8 for f32).  Large tiles amortize per-grid-step overhead; the byte
    # budget keeps double-buffered streamed tiles v5e-safe.
    itemsize_c = jnp.dtype(compute_dtype).itemsize
    sub = {1: 32, 2: 16}.get(itemsize_c, 8)
    row_stream_bytes = (n_states * jnp.dtype(x.dtype).itemsize   # x tile in
                        + n_actions * 4                          # out tile
                        + S * itemsize_c)                        # K-pad scratch
    tb_cap = max(sub, ((6 * 1024 * 1024) // max(row_stream_bytes, 1)) // sub * sub)
    TB = max(sub, min(_round_up(block_batch, sub), tb_cap, _round_up(B, sub)))
    B_pad = _round_up(B, TB)
    grid = (B_pad // TB,)

    # Pad only the batch dim of x (<= TB-1 zero rows).  The feature dim is
    # passed unpadded: its block equals the full array dim (128-lane exempt).
    xb = x if B_pad == B else jnp.pad(x, ((0, B_pad - B), (0, 0)))

    w1p, b1p, w2p, b2p = _pad_params(w1, b1, w2, b2, compute_dtype)

    bound_f = float(bound)        # static -> folded as compile-time constant
    need_kpad = (S != n_states)
    scratch_shapes = [pltpu.VMEM((TB, S), compute_dtype)] if need_kpad else []

    def kernel(x_ref, w1_ref, b1_ref, w2_ref, b2_ref, o_ref, *scratch):
        if need_kpad:
            # Build the lane-dense [TB, S] lhs in VMEM: cast the raw x tile
            # and zero the padded K lanes (re-zeroed every step so the kernel
            # stays correct if megacore splits the parallel batch axis).
            xs_ref = scratch[0]
            xs_ref[:, n_states:] = jnp.zeros((TB, S - n_states), compute_dtype)
            xs_ref[:, :n_states] = x_ref[...].astype(compute_dtype)
            lhs = xs_ref[...]
        else:
            lhs = x_ref[...].astype(compute_dtype)

        # fc1: [TB, S] @ [S, H] on the MXU (f32 accumulate); f32 bias + ReLU.
        h = jnp.dot(lhs, w1_ref[...], preferred_element_type=jnp.float32)
        h = jnp.maximum(h + b1_ref[...], 0.0)

        # out: [TB, H] @ [H, A] stays lane-dense on the MXU; slice down to the
        # real n_actions columns before the (now tiny) epilogue and the
        # narrow output store.
        y = jnp.dot(h.astype(compute_dtype), w2_ref[...],
                    preferred_element_type=jnp.float32)
        y = y[:, :n_actions] + b2_ref[...]
        o_ref[...] = (jnp.tanh(y) * bound_f).astype(o_ref.dtype)

    out = pl.pallas_call(
        kernel,
        out_shape=jax.ShapeDtypeStruct((B_pad, n_actions), jnp.float32),
        grid_spec=pltpu.PrefetchScalarGridSpec(
            num_scalar_prefetch=0,
            grid=grid,
            in_specs=[
                # Streamed raw-x batch tile (feature dim unpadded).  If a
                # trace ever shows exposed input DMA, add
                # pipeline_mode=pl.Buffered(3) here only.
                pl.BlockSpec((TB, n_states), lambda i: (i, 0)),
                # Weights / biases: constant index_map -> VMEM-resident.
                pl.BlockSpec((S, H), lambda i: (0, 0)),
                pl.BlockSpec((1, H), lambda i: (0, 0)),
                pl.BlockSpec((H, A), lambda i: (0, 0)),
                pl.BlockSpec((1, n_actions), lambda i: (0, 0)),
            ],
            # Unpadded narrow output: masked store, but ~64x fewer HBM bytes
            # than a 128-lane-padded f32 output.
            out_specs=pl.BlockSpec((TB, n_actions), lambda i: (i, 0)),
            scratch_shapes=scratch_shapes,
        ),
        compiler_params=pltpu.CompilerParams(
            dimension_semantics=("parallel",),   # v7x: shard batch over 2 TCs
        ),
    )(xb, w1p, b1p, w2p, b2p)

    # Padded batch rows (B..B_pad) hold non-zero junk outputs; slice them off.
    return out if B_pad == B else out[:B]


def init_params(key, n_states, n_actions, n_neurons=30):
    """Mirror the PyTorch init: weights ~ N(0, 0.1); biases ~ torch default
    U(-1/sqrt(fan_in), 1/sqrt(fan_in))."""
    k1, k2, k3, k4 = jax.random.split(key, 4)
    w1 = 0.1 * jax.random.normal(k1, (n_states, n_neurons), dtype=jnp.float32)
    bnd1 = 1.0 / jnp.sqrt(n_states)
    b1 = jax.random.uniform(k2, (n_neurons,), dtype=jnp.float32,
                            minval=-bnd1, maxval=bnd1)
    w2 = 0.1 * jax.random.normal(k3, (n_neurons, n_actions), dtype=jnp.float32)
    bnd2 = 1.0 / jnp.sqrt(n_neurons)
    b2 = jax.random.uniform(k4, (n_actions,), dtype=jnp.float32,
                            minval=-bnd2, maxval=bnd2)
    return w1, b1, w2, b2


def reference_forward(x, w1, b1, w2, b2, bound):
    h = jnp.maximum(x @ w1 + b1, 0.0)
    return jnp.tanh(h @ w2 + b2) * bound


if __name__ == "__main__":
    key = jax.random.PRNGKey(0)
    kx, kp = jax.random.split(key)

    batch = 4
    n_states = 8
    n_actions = 2
    n_neurons = 30
    a_bound = 1.0

    x = jax.random.normal(kx, (batch, n_states), dtype=jnp.float32)
    w1, b1, w2, b2 = init_params(kp, n_states, n_actions, n_neurons)
    ref = reference_forward(x, w1, b1, w2, b2, a_bound)

    # Exact-ish f32 path: tight check against the reference.
    fwd_f32 = jax.jit(functools.partial(
        asv_actor_forward, bound=a_bound, compute_dtype=jnp.float32))
    out_f32 = jax.block_until_ready(fwd_f32(x, w1, b1, w2, b2))
    assert out_f32.shape == (batch, n_actions)
    assert jnp.allclose(out_f32, ref, atol=1e-5, rtol=1e-5), "f32 path mismatch"

    # Default bf16-MXU path (v6e/v7x fast path): looser tolerance.
    fwd_bf16 = jax.jit(functools.partial(
        asv_actor_forward, bound=a_bound, compute_dtype=jnp.bfloat16))
    out_bf16 = jax.block_until_ready(fwd_bf16(x, w1, b1, w2, b2))
    assert out_bf16.shape == (batch, n_actions)
    assert jnp.allclose(out_bf16, ref, atol=2e-2, rtol=2e-2), "bf16 path mismatch"

    print("KERNEL_OK")
</pallas_src>

<mosaic_0001>
module attributes {stable_mosaic.version = 11 : i64} {
  func.func @kernel(%arg0: i32, %arg1: memref<8x8xf32, #tpu.memory_space<vmem>>, %arg2: memref<128x128xf32, #tpu.memory_space<vmem>>, %arg3: memref<1x128xf32, #tpu.memory_space<vmem>>, %arg4: memref<128x128xf32, #tpu.memory_space<vmem>>, %arg5: memref<1x2xf32, #tpu.memory_space<vmem>>, %arg6: memref<8x2xf32, #tpu.memory_space<vmem>>, %arg7: memref<8x128xf32, #tpu.memory_space<vmem>>) attributes {dimension_semantics = [#tpu.dimension_semantics<parallel>], iteration_bounds = array<i64: 1>, scalar_prefetch = 0 : i64, scratch_operands = 1 : i64, tpu.core_type = #tpu.core_type<tc>, window_params = [{transform_indices = @transform_0, window_bounds = array<i64: 8, 8>}, {pipeline_mode = #tpu.pipeline_mode<synchronous>, transform_indices = @transform_1, window_bounds = array<i64: 128, 128>}, {pipeline_mode = #tpu.pipeline_mode<synchronous>, transform_indices = @transform_2, window_bounds = array<i64: 1, 128>}, {pipeline_mode = #tpu.pipeline_mode<synchronous>, transform_indices = @transform_3, window_bounds = array<i64: 128, 128>}, {pipeline_mode = #tpu.pipeline_mode<synchronous>, transform_indices = @transform_4, window_bounds = array<i64: 1, 2>}, {transform_indices = @transform_5, window_bounds = array<i64: 8, 2>}]} {
    %cst = arith.constant 0.000000e+00 : f32
    %0 = vector.broadcast %cst : f32 to vector<8x120xf32>
    %c0 = arith.constant 0 : index
    %c8 = arith.constant 8 : index
    %1 = vector.load %arg7[%c0, %c8] : memref<8x128xf32, #tpu.memory_space<vmem>>, vector<8x120xf32>
    tpu.vector_store %arg7[%c0, %c8], %0 {strides = array<i32>} : memref<8x128xf32, #tpu.memory_space<vmem>>, vector<8x120xf32>,
    %c0_0 = arith.constant 0 : index
    %c0_1 = arith.constant 0 : index
    %2 = vector.load %arg1[%c0_0, %c0_1] : memref<8x8xf32, #tpu.memory_space<vmem>>, vector<8x8xf32>
    %c0_2 = arith.constant 0 : index
    %c0_3 = arith.constant 0 : index
    %3 = vector.load %arg7[%c0_2, %c0_3] : memref<8x128xf32, #tpu.memory_space<vmem>>, vector<8x8xf32>
    tpu.vector_store %arg7[%c0_2, %c0_3], %2 {strides = array<i32>} : memref<8x128xf32, #tpu.memory_space<vmem>>, vector<8x8xf32>,
    %c0_4 = arith.constant 0 : index
    %c0_5 = arith.constant 0 : index
    %4 = vector.load %arg7[%c0_4, %c0_5] : memref<8x128xf32, #tpu.memory_space<vmem>>, vector<8x128xf32>
    %c0_6 = arith.constant 0 : index
    %c0_7 = arith.constant 0 : index
    %5 = vector.load %arg2[%c0_6, %c0_7] : memref<128x128xf32, #tpu.memory_space<vmem>>, vector<128x128xf32>
    %cst_8 = arith.constant dense<0.000000e+00> : vector<8x128xf32>
    %6 = tpu.matmul %4, %5, %cst_8 {dimension_numbers = #tpu.dot_dimension_numbers<[1], [0], [0], [1], [0, 0, 1, 1], [], []>} : vector<8x128xf32>, vector<128x128xf32>, vector<8x128xf32> -> vector<8x128xf32>
    %c0_9 = arith.constant 0 : index
    %c0_10 = arith.constant 0 : index
    %7 = vector.load %arg3[%c0_9, %c0_10] : memref<1x128xf32, #tpu.memory_space<vmem>>, vector<1x128xf32>
    %8 = vector.broadcast %7 : vector<1x128xf32> to vector<8x128xf32>
    %9 = arith.addf %6, %8 : vector<8x128xf32>
    %cst_11 = arith.constant 0.000000e+00 : f32
    %10 = vector.broadcast %cst_11 : f32 to vector<8x128xf32>
    %11 = arith.maximumf %9, %10 : vector<8x128xf32>
    %c0_12 = arith.constant 0 : index
    %c0_13 = arith.constant 0 : index
    %12 = vector.load %arg4[%c0_12, %c0_13] : memref<128x128xf32, #tpu.memory_space<vmem>>, vector<128x128xf32>
    %cst_14 = arith.constant dense<0.000000e+00> : vector<8x128xf32>
    %13 = tpu.matmul %11, %12, %cst_14 {dimension_numbers = #tpu.dot_dimension_numbers<[1], [0], [0], [1], [0, 0, 1, 1], [], []>} : vector<8x128xf32>, vector<128x128xf32>, vector<8x128xf32> -> vector<8x128xf32>
    %14 = vector.extract_strided_slice %13 {offsets = [0, 0], sizes = [8, 2], strides = [1, 1]} : vector<8x128xf32> to vector<8x2xf32>
    %c0_15 = arith.constant 0 : index
    %c0_16 = arith.constant 0 : index
    %15 = vector.load %arg5[%c0_15, %c0_16] : memref<1x2xf32, #tpu.memory_space<vmem>>, vector<1x2xf32>
    %16 = vector.broadcast %15 : vector<1x2xf32> to vector<8x2xf32>
    %17 = arith.addf %14, %16 : vector<8x2xf32>
    %18 = math.tanh %17 : vector<8x2xf32>
    %cst_17 = arith.constant 1.000000e+00 : f32
    %19 = vector.broadcast %cst_17 : f32 to vector<8x2xf32>
    %20 = arith.mulf %18, %19 : vector<8x2xf32>
    %c0_18 = arith.constant 0 : index
    %c0_19 = arith.constant 0 : index
    %21 = vector.load %arg6[%c0_18, %c0_19] : memref<8x2xf32, #tpu.memory_space<vmem>>, vector<8x2xf32>
    tpu.vector_store %arg6[%c0_18, %c0_19], %20 {strides = array<i32>} : memref<8x2xf32, #tpu.memory_space<vmem>>, vector<8x2xf32>,
    return
  }
  func.func @transform_0(%arg0: i32) -> (i32, i32) {
    %c0_i32 = arith.constant 0 : i32
    %c0_i32_0 = arith.constant 0 : i32
    return %arg0, %c0_i32 : i32, i32
  }
  func.func @transform_1(%arg0: i32) -> (i32, i32) {
    %c0_i32 = arith.constant 0 : i32
    %c0_i32_0 = arith.constant 0 : i32
    %c0_i32_1 = arith.constant 0 : i32
    return %c0_i32, %c0_i32_0 : i32, i32
  }
  func.func @transform_2(%arg0: i32) -> (i32, i32) {
    %c0_i32 = arith.constant 0 : i32
    %c0_i32_0 = arith.constant 0 : i32
    %c0_i32_1 = arith.constant 0 : i32
    return %c0_i32, %c0_i32_0 : i32, i32
  }
  func.func @transform_3(%arg0: i32) -> (i32, i32) {
    %c0_i32 = arith.constant 0 : i32
    %c0_i32_0 = arith.constant 0 : i32
    %c0_i32_1 = arith.constant 0 : i32
    return %c0_i32, %c0_i32_0 : i32, i32
  }
  func.func @transform_4(%arg0: i32) -> (i32, i32) {
    %c0_i32 = arith.constant 0 : i32
    %c0_i32_0 = arith.constant 0 : i32
    %c0_i32_1 = arith.constant 0 : i32
    return %c0_i32, %c0_i32_0 : i32, i32
  }
  func.func @transform_5(%arg0: i32) -> (i32, i32) {
    %c0_i32 = arith.constant 0 : i32
    %c0_i32_0 = arith.constant 0 : i32
    return %arg0, %c0_i32 : i32, i32
  }
}

</mosaic_0001>

<bundles_post_ra>
// kernel: asv_actor_forward.1
= control target key start
LH: loop header
LB: loop body
LE: loop exit
PB: predicated region body
PF: predicated region fallthrough
CT: control target
= control target key end

     0   :  { %vm20_vm0 = vcmask 1047616   ;;  %v380_v0 = vmov 0.0|0.0   ;;  %v381_v4 = vmov 0.0   ;;  %vm382_vm1 = vmmov 0   ;;  %s537_s1 = inlined_call_operand.vmem [shape: f32[128,128], index: 1, kind: input, shape index: {}]   ;;  %s538_s0 = inlined_call_operand.vmem [shape: f32[8,8], index: 0, kind: input, shape index: {}]   ;;  %s539_s3 = inlined_call_operand.vmem [shape: f32[128,128], index: 3, kind: input, shape index: {}]   ;;  %s540_s2 = inlined_call_operand.vmem [shape: f32[1,128], index: 2, kind: input, shape index: {}]   ;;  %s541_s4 = inlined_call_operand.vmem [shape: f32[1,2], index: 4, kind: input, shape index: {}]   ;;  %s542_s5 = inlined_call_operand.vmem [shape: f32[8,2], index: 5, kind: output, shape index: {}]  }
   0x1   :  { %327 = vmatprep.subr.bf16.mxu0 %v380_v0  ;;  %v26_v1 = vld [vmem:[%s537_s1] sm:$0xff]  ;;  %v27_v2 = vld [vmem:[%s537_s1 + $0x8] sm:$0xff]  ;;  %v28_v3 = vld [vmem:[%s537_s1 + $0x10] sm:$0xff]  ;;  %21 = vst.msk [vmem:[#allocation2] sm:$0xff] %vm20_vm0, %v381_v4  ;;  %351 = vmatprep.subr.bf16.mxu1 %v380_v0  ;;  %vm23_vm2 = vcmask 64512   ;;  %vm215_vm3 = vcmask 15360  }
   0x2   :  { %v328_v5 = vpack.c.bf16 %v27_v2, %v26_v1  ;;  %v29_v6 = vld [vmem:[%s537_s1 + $0x18] sm:$0xff]  ;;  %289 = vmatprep.mubr.msk.f32.mxu0 %vm382_vm1, %v381_v4  ;;  %324 = vmatprep.mubr.msk.f32.mxu1 %vm382_vm1, %v381_v4  ;;  %v30_v8 = vld [vmem:[%s537_s1 + $0x20] sm:$0xff]  ;;  %v31_v9 = vld [vmem:[%s537_s1 + $0x28] sm:$0xff] }
   0x3   :  { %v331_v7 = vpack.c.bf16 %v29_v6, %v28_v3  ;;  %v22_v10 = vld [vmem:[%s538_s0] sm:$0xff]  ;;  %v121_v12 = vld [vmem:[%s539_s3 + $0x8] sm:$0xff]  ;;  %v122_v13 = vld [vmem:[%s539_s3 + $0x10] sm:$0xff]  ;;  %v334_v15 = vpack.c.bf16 %v31_v9, %v30_v8 }
   0x4   :  { %329 = vmatpush3.bf16.msra.mxu0 %v328_v5  ;;  %v120_v11 = vld [vmem:[%s539_s3] sm:$0xff]  ;;  %24 = vst.msk [vmem:[#allocation2] sm:$0xff] %vm23_vm2, %v22_v10  ;;  %v123_v14 = vld [vmem:[%s539_s3 + $0x18] sm:$0xff]  ;;  %v32_v17 = vld [vmem:[%s537_s1 + $0x30] sm:$0xff] }
   0x5   :  { %330 = vmatprep.subr.bf16.mxu0 %v380_v0  ;;  %v352_v16 = vpack.c.bf16 %v121_v12, %v120_v11  ;;  %v33_v18 = vld [vmem:[%s537_s1 + $0x38] sm:$0xff]  ;;  %v355_v19 = vpack.c.bf16 %v123_v14, %v122_v13  ;;  %v124_v20 = vld [vmem:[%s539_s3 + $0x20] sm:$0xff]  ;;  %v125_v21 = vld [vmem:[%s539_s3 + $0x28] sm:$0xff] }
   0x6   :  { %v337_v22 = vpack.c.bf16 %v33_v18, %v32_v17  ;;  %v34_v23 = vld [vmem:[%s537_s1 + $0x40] sm:$0xff]  ;;  %v35_v24 = vld [vmem:[%s537_s1 + $0x48] sm:$0xff]  ;;  %v358_v25 = vpack.c.bf16 %v125_v21, %v124_v20  ;;  %v126_v26 = vld [vmem:[%s539_s3 + $0x30] sm:$0xff] }
   0x7   :  { %353 = vmatpush3.bf16.msra.mxu1 %v352_v16  ;;  %v127_v27 = vld [vmem:[%s539_s3 + $0x38] sm:$0xff]  ;;  %v340_v28 = vpack.c.bf16 %v35_v24, %v34_v23  ;;  %v36_v29 = vld [vmem:[%s537_s1 + $0x50] sm:$0xff]  ;;  %v128_v32 = vld [vmem:[%s539_s3 + $0x40] sm:$0xff] }
   0x8   :  { %332 = vmatpush3.bf16.msra.mxu0 %v331_v7  ;;  %354 = vmatprep.subr.bf16.mxu1 %v380_v0  ;;  %v37_v30 = vld [vmem:[%s537_s1 + $0x58] sm:$0xff]  ;;  %v361_v31 = vpack.c.bf16 %v127_v27, %v126_v26  ;;  %v129_v33 = vld [vmem:[%s539_s3 + $0x48] sm:$0xff]  ;;  %v38_v35 = vld [vmem:[%s537_s1 + $0x60] sm:$0xff] }
   0x9   :  { %333 = vmatprep.subr.bf16.mxu0 %v380_v0  ;;  %v343_v34 = vpack.c.bf16 %v37_v30, %v36_v29  ;;  %v39_v36 = vld [vmem:[%s537_s1 + $0x68] sm:$0xff]  ;;  %v364_v37 = vpack.c.bf16 %v129_v33, %v128_v32  ;;  %v130_v38 = vld [vmem:[%s539_s3 + $0x50] sm:$0xff]  ;;  %v131_v39 = vld [vmem:[%s539_s3 + $0x58] sm:$0xff] }
   0xa   :  { %v346_v40 = vpack.c.bf16 %v39_v36, %v38_v35  ;;  %v40_v41 = vld [vmem:[%s537_s1 + $0x70] sm:$0xff]  ;;  %v41_v42 = vld [vmem:[%s537_s1 + $0x78] sm:$0xff]  ;;  %v367_v43 = vpack.c.bf16 %v131_v39, %v130_v38  ;;  %v132_v44 = vld [vmem:[%s539_s3 + $0x60] sm:$0xff] }
   0xb   :  { %356 = vmatpush3.bf16.msra.mxu1 %v355_v19  ;;  %v133_v45 = vld [vmem:[%s539_s3 + $0x68] sm:$0xff]  ;;  %v349_v46 = vpack.c.bf16 %v41_v42, %v40_v41  ;;  %v25_v48 = vld [vmem:[#allocation2] sm:$0xff]  ;;  %v134_v49 = vld [vmem:[%s539_s3 + $0x70] sm:$0xff] }
   0xc   :  { %335 = vmatpush3.bf16.msra.mxu0 %v334_v15  ;;  %357 = vmatprep.subr.bf16.mxu1 %v380_v0  ;;  %v370_v47 = vpack.c.bf16 %v133_v45, %v132_v44  ;;  %v135_v50 = vld [vmem:[%s539_s3 + $0x78] sm:$0xff]  ;;  %v221_v52 = vld [vmem:[%s540_s2] ss:$0 sm:$0xff] }
   0xd   :  { %336 = vmatprep.subr.bf16.mxu0 %v380_v0  ;;  %v373_v51 = vpack.c.bf16 %v135_v50, %v134_v49  ;;  %v222_v57 = vld [vmem:[%s541_s4] ss:$0 sm:$0xff] }
   0xf   :  { %359 = vmatpush3.bf16.msra.mxu1 %v358_v25 }
  0x10   :  { %338 = vmatpush3.bf16.msra.mxu0 %v337_v22  ;;  %360 = vmatprep.subr.bf16.mxu1 %v380_v0 }
  0x11   :  { %339 = vmatprep.subr.bf16.mxu0 %v380_v0 }
  0x13   :  { %362 = vmatpush3.bf16.msra.mxu1 %v361_v31 }
  0x14   :  { %341 = vmatpush3.bf16.msra.mxu0 %v340_v28  ;;  %363 = vmatprep.subr.bf16.mxu1 %v380_v0 }
  0x15   :  { %342 = vmatprep.subr.bf16.mxu0 %v380_v0 }
  0x17   :  { %365 = vmatpush3.bf16.msra.mxu1 %v364_v37 }
  0x18   :  { %344 = vmatpush3.bf16.msra.mxu0 %v343_v34  ;;  %366 = vmatprep.subr.bf16.mxu1 %v380_v0 }
  0x19   :  { %345 = vmatprep.subr.bf16.mxu0 %v380_v0 }
  0x1b   :  { %368 = vmatpush3.bf16.msra.mxu1 %v367_v43 }
  0x1c   :  { %347 = vmatpush3.bf16.msra.mxu0 %v346_v40  ;;  %369 = vmatprep.subr.bf16.mxu1 %v380_v0 }
  0x1d   :  { %348 = vmatprep.subr.bf16.mxu0 %v380_v0 }
  0x1f   :  { %371 = vmatpush3.bf16.msra.mxu1 %v370_v47 }
  0x20   :  { %350 = vmatpush3.bf16.msra.mxu0 %v349_v46  ;;  %372 = vmatprep.subr.bf16.mxu1 %v380_v0 }
  0x23   :  { %290 = vmatmul.mubr.f32.vlgmr.msra.gmra.mrb[0].mxu0 %v25_v48  ;;  %374 = vmatpush3.bf16.msra.mxu1 %v373_v51 }
  0xf6   :  { %v115_v53 = vpop.f32.mrb[0].mxu0 }
  0xf7   :  { %v116_v54 = vadd.f32 %v221_v52, %v115_v53  ;;  %v291_v55 = vpop.f32.mrb[1].mxu0 }
  0xf9   :  { %v119_v56 = vmax.f32 %v116_v54, 0.0 }
  0xfb   :  { %325 = vmatmul.mubr.f32.vlgmr.msra.gmra.mrb[0].mxu1 %v119_v56 }
 0x1ce   :  { %v202_v58 = vpop.f32.mrb[0].mxu1 }
 0x1cf   :  { %v213_v59 = vadd.f32 %v222_v57, %v202_v58  ;;  %v326_v60 = vpop.f32.mrb[1].mxu1 }
 0x1d1   :  { %378 = vtanh.f32 %v213_v59 }
 0x1db   :  { %v379_v61 = vpop.eup %378 }
 0x1dc   :  { %216 = vst.msk [vmem:[%s542_s5] sm:$0xff] %vm215_vm3, %v379_v61 }

</bundles_post_ra>
